<compile_context>
chip_gen: v6e
topology: v6e:2x2x1
jax: 0.10.0
libtpu: 0.0.40
codegen_flags: <defaults>
</compile_context>

<pallas_src>
import collections
import functools

import numpy as np

import jax
import jax.numpy as jnp
from jax.experimental import pallas as pl
from jax.experimental.pallas import tpu as pltpu

LANE = 128
SUBLANE = 8


def _round_up(x, m):
    return ((x + m - 1) // m) * m


_Meta = collections.namedtuple(
    "_Meta", ["num_hidden", "segments", "out_width", "num_classes", "num_domains"])


# ---------------------------------------------------------------------------
# Fused Pallas kernel
# ---------------------------------------------------------------------------

def _make_fused_kernel(num_hidden, segments, out_width, n_seg_pad):
    """x -> [Linear(bf16 MXU)+ReLU]*num_hidden -> fused-head Linear ->
    per-segment log-softmax (single exp + one-hot MXU matmuls)."""
    n_seg = len(segments)

    def kernel(*refs):
        x_ref = refs[0]
        o_ref = refs[-1]
        onehot_t_ref = refs[-2]   # (n_seg_pad, ho_pad) f32
        onehot_ref = refs[-3]     # (ho_pad, n_seg_pad) f32
        p = refs[1:-3]            # (w, b) pairs: hidden layers, then fused head

        h = x_ref[...].astype(jnp.float32)
        for li in range(num_hidden):
            w = p[2 * li][...]            # bf16 (K, N)
            b = p[2 * li + 1][...]        # f32  (1, N) -> broadcast over rows
            acc = jnp.dot(h.astype(jnp.bfloat16), w,
                          preferred_element_type=jnp.float32)
            h = jnp.maximum(acc + b, 0.0)

        w_head = p[2 * num_hidden][...]
        b_head = p[2 * num_hidden + 1][...]
        z = jnp.dot(h.astype(jnp.bfloat16), w_head,
                    preferred_element_type=jnp.float32) + b_head

        # ----- fused per-segment log-softmax -----------------------------
        # Per-segment maxes (small masked XLU maxes), scattered back to
        # columns with a where-chain; then ONE full-width exp; segmented
        # sums + lse scatter go through tiny one-hot matmuls on the MXU.
        col = jax.lax.broadcasted_iota(jnp.int32, z.shape, 1)
        neg = jnp.float32(-1e30)
        max_cols = jnp.zeros_like(z)
        for (start, stop) in segments:
            mask = (col >= start) & (col < stop)
            m_s = jnp.max(jnp.where(mask, z, neg), axis=1, keepdims=True)
            max_cols = jnp.where(mask, m_s, max_cols)

        e = jnp.exp(z - max_cols)                                   # 1 exp
        seg_sum = jnp.dot(e, onehot_ref[...],
                          preferred_element_type=jnp.float32)       # (R, n_seg_pad)
        seg_col = jax.lax.broadcasted_iota(jnp.int32, seg_sum.shape, 1)
        seg_sum = jnp.where(seg_col < n_seg, seg_sum, 1.0)          # guard padded segs
        seg_log = jnp.log(seg_sum)
        lse_cols = jnp.dot(seg_log, onehot_t_ref[...],
                           preferred_element_type=jnp.float32)      # scatter lse

        valid = col < out_width
        o_ref[...] = jnp.where(valid, z - max_cols - lse_cols,
                               0.0).astype(o_ref.dtype)

    return kernel


def _fused_forward(x, flat_params, onehot, onehot_t, meta):
    """x: (rows, in_dim) f32.  Returns (rows_pad, ho_pad) f32 log-probs."""
    rows, in_dim = x.shape
    ho_pad, n_seg_pad = onehot.shape
    num_hidden = meta.num_hidden

    # Row tiling: single block only for tiny batches; otherwise >=2 tiles so
    # the "parallel" grid axis can shard across TensorCores (v7x megacore),
    # capped at 512 rows/tile (amortizes ~0.35us/step, easily fits VMEM).
    rows8 = _round_up(rows, SUBLANE)
    n_tiles = max(1, -(-rows8 // 512))
    if n_tiles == 1 and rows8 > 16:
        n_tiles = 2
    tile_rows = _round_up(-(-rows8 // n_tiles), SUBLANE)
    rows_pad = n_tiles * tile_rows
    if rows_pad != rows:
        x = jnp.pad(x, ((0, rows_pad - rows), (0, 0)))

    kernel = _make_fused_kernel(num_hidden, meta.segments, meta.out_width, n_seg_pad)

    # Input keeps its true (unpadded) feature width: full-dim last axis.
    in_specs = [pl.BlockSpec((tile_rows, in_dim), lambda i: (i, 0))]
    # Constant block index -> weights / one-hots are DMA'd once, stay in VMEM.
    # (For very large hidden layers, also consider pipeline_mode=pl.Buffered(1)
    #  on these specs or a K-tiling grid axis to protect v7x's 64 MiB VMEM.)
    for arr in flat_params:
        in_specs.append(pl.BlockSpec(arr.shape, lambda i: (0, 0)))
    in_specs.append(pl.BlockSpec(onehot.shape, lambda i: (0, 0)))
    in_specs.append(pl.BlockSpec(onehot_t.shape, lambda i: (0, 0)))

    # Advisory cost estimate for XLA's scheduler.
    flops = 0
    for li in range(num_hidden + 1):
        w = flat_params[2 * li]
        flops += 2 * rows_pad * w.shape[0] * w.shape[1]
    flops += 2 * 2 * rows_pad * ho_pad * n_seg_pad        # epilogue one-hot matmuls
    transcendentals = rows_pad * (ho_pad + n_seg_pad)
    param_bytes = sum(int(a.size) * a.dtype.itemsize for a in flat_params)
    bytes_accessed = (int(x.size) * 4 + param_bytes
                      + (int(onehot.size) + int(onehot_t.size)) * 4
                      + rows_pad * ho_pad * 4)

    # Leave the VMEM limit at its default unless resident weights are large.
    est_vmem = 2 * param_bytes + 2 * tile_rows * (in_dim + 2 * ho_pad) * 4 + (4 << 20)
    vmem_limit = None
    if est_vmem > (30 << 20):
        vmem_limit = min(est_vmem, 64 << 20)

    return pl.pallas_call(
        kernel,
        out_shape=jax.ShapeDtypeStruct((rows_pad, ho_pad), jnp.float32),
        grid=(n_tiles,),
        in_specs=in_specs,
        out_specs=pl.BlockSpec((tile_rows, ho_pad), lambda i: (i, 0)),
        compiler_params=pltpu.CompilerParams(
            dimension_semantics=("parallel",),
            vmem_limit_bytes=vmem_limit),
        cost_estimate=pl.CostEstimate(
            flops=int(flops),
            transcendentals=int(transcendentals),
            bytes_accessed=int(bytes_accessed)),
    )(x, *flat_params, onehot, onehot_t)


# ---------------------------------------------------------------------------
# Parameter init + one-time prep
# ---------------------------------------------------------------------------

def init_mdanet_params(configs, key):
    """nn.Linear-style init. Weights stored as (in_features, out_features)."""
    input_dim = configs["input_dim"]
    hidden_layers = configs["hidden_layers"]
    num_classes = configs["num_classes"]
    num_domains = configs["num_domains"]

    num_neurons = [input_dim] + list(hidden_layers)

    def linear_init(key, fan_in, fan_out):
        kw, kb = jax.random.split(key)
        bound = 1.0 / jnp.sqrt(fan_in)
        w = jax.random.uniform(kw, (fan_in, fan_out), jnp.float32, -bound, bound)
        b = jax.random.uniform(kb, (fan_out,), jnp.float32, -bound, bound)
        return w, b

    keys = jax.random.split(key, len(num_neurons) - 1 + 1 + num_domains)
    k_idx = 0

    hiddens = []
    for i in range(len(num_neurons) - 1):
        hiddens.append(linear_init(keys[k_idx], num_neurons[i], num_neurons[i + 1]))
        k_idx += 1

    softmax_layer = linear_init(keys[k_idx], num_neurons[-1], num_classes)
    k_idx += 1

    domains = []
    for _ in range(num_domains):
        domains.append(linear_init(keys[k_idx], num_neurons[-1], 2))
        k_idx += 1

    return {"hiddens": hiddens, "softmax": softmax_layer, "domains": domains}


def prepare_mdanet_params(params):
    """One-time prep: fuse heads, zero-pad out-dims to 128 lanes, cast weight
    matrices to bf16 (MXU operand dtype), build one-hot segment matrices.
    Zero padding is exact through ReLU and excluded from every segment."""
    hiddens = params["hiddens"]
    sw, sb = params["softmax"]
    domains = params["domains"]

    num_classes = sw.shape[1]
    num_domains = len(domains)
    num_hidden = len(hiddens)
    in_dim = hiddens[0][0].shape[0] if num_hidden else sw.shape[0]

    head_w = jnp.concatenate([sw] + [w for (w, _) in domains], axis=1)
    head_b = jnp.concatenate([sb] + [b for (_, b) in domains], axis=0)

    flat_params = []
    prev = in_dim                      # first-layer K stays the true in_dim
    for (w, b) in hiddens:
        fi, fo = w.shape
        fo_pad = _round_up(fo, LANE)
        wp = jnp.pad(w.astype(jnp.float32),
                     ((0, prev - fi), (0, fo_pad - fo))).astype(jnp.bfloat16)
        bp = jnp.pad(b.astype(jnp.float32), (0, fo_pad - fo)).reshape(1, fo_pad)
        flat_params += [wp, bp]
        prev = fo_pad

    hi, ho = head_w.shape
    ho_pad = _round_up(ho, LANE)
    flat_params.append(
        jnp.pad(head_w.astype(jnp.float32),
                ((0, prev - hi), (0, ho_pad - ho))).astype(jnp.bfloat16))
    flat_params.append(
        jnp.pad(head_b.astype(jnp.float32), (0, ho_pad - ho)).reshape(1, ho_pad))

    segments = ((0, num_classes),) + tuple(
        (num_classes + 2 * i, num_classes + 2 * i + 2) for i in range(num_domains))

    n_seg = len(segments)
    n_seg_pad = _round_up(n_seg, LANE)
    onehot_np = np.zeros((ho_pad, n_seg_pad), np.float32)
    for s, (start, stop) in enumerate(segments):
        onehot_np[start:stop, s] = 1.0
    onehot = jnp.asarray(onehot_np)
    onehot_t = jnp.asarray(np.ascontiguousarray(onehot_np.T))

    meta = _Meta(num_hidden=num_hidden, segments=segments, out_width=ho,
                 num_classes=num_classes, num_domains=num_domains)
    arrays = (tuple(flat_params), onehot, onehot_t)
    return meta, arrays


# ---------------------------------------------------------------------------
# Forward (mirror of MDANet.forward; gradient reversal is identity forward)
# ---------------------------------------------------------------------------

@functools.partial(jax.jit, static_argnums=(0,))
def _forward_impl(meta, arrays, sinputs, tinputs):
    flat_params, onehot, onehot_t = arrays

    # Stack source batches + target batch -> one pass through the shared MLP.
    x = jnp.concatenate([s.astype(jnp.float32) for s in sinputs]
                        + [tinputs.astype(jnp.float32)], axis=0)
    out = _fused_forward(x, flat_params, onehot, onehot_t, meta)

    C = meta.num_classes
    k = meta.num_domains
    offs = [0]
    for s in sinputs:                       # honour per-source batch sizes
        offs.append(offs[-1] + s.shape[0])
    tb = tinputs.shape[0]

    # One slice for the source block, one for the target block; per-head
    # column windows come off those (fused by XLA).
    src = out[:offs[-1]]
    tgt = out[offs[-1]:offs[-1] + tb]
    logprobs = [src[offs[i]:offs[i + 1], :C] for i in range(k)]
    sdomains = [src[offs[i]:offs[i + 1], C + 2 * i:C + 2 * i + 2] for i in range(k)]
    tdomains = [tgt[:, C + 2 * i:C + 2 * i + 2] for i in range(k)]
    return logprobs, sdomains, tdomains


def mdanet_forward(prepared_params, sinputs, tinputs):
    meta, arrays = prepared_params
    return _forward_impl(meta, arrays, sinputs, tinputs)


# ---------------------------------------------------------------------------
# Pure-JAX references (for correctness checking only)
# ---------------------------------------------------------------------------

def _reference_forward(params, sinputs, tinputs, *, bf16_matmul=False):
    def matmul(h, w):
        if bf16_matmul:
            return jnp.dot(h.astype(jnp.bfloat16), w.astype(jnp.bfloat16),
                           preferred_element_type=jnp.float32)
        return h @ w

    def mlp(h):
        h = h.astype(jnp.float32)
        for (w, b) in params["hiddens"]:
            h = jax.nn.relu(matmul(h, w) + b)
        return h

    sh = [mlp(s) for s in sinputs]
    th = mlp(tinputs)
    sw, sb = params["softmax"]
    logprobs = [jax.nn.log_softmax(matmul(h, sw) + sb, axis=1) for h in sh]
    sdom, tdom = [], []
    for i, (dw, db) in enumerate(params["domains"]):
        sdom.append(jax.nn.log_softmax(matmul(sh[i], dw) + db, axis=1))
        tdom.append(jax.nn.log_softmax(matmul(th, dw) + db, axis=1))
    return logprobs, sdom, tdom


# ---------------------------------------------------------------------------
# Demo / smoke test
# ---------------------------------------------------------------------------

if __name__ == "__main__":
    configs = {
        "input_dim": 32,
        "hidden_layers": [64, 32],
        "num_classes": 4,
        "num_domains": 2,
    }
    batch = 8

    root_key = jax.random.PRNGKey(0)
    k_params, k_s0, k_s1, k_t = jax.random.split(root_key, 4)

    params = init_mdanet_params(configs, k_params)
    prepared = prepare_mdanet_params(params)   # one-time weight prep

    sinputs = [
        jax.random.normal(k_s0, (batch, configs["input_dim"]), jnp.float32),
        jax.random.normal(k_s1, (batch, configs["input_dim"]), jnp.float32),
    ]
    tinputs = jax.random.normal(k_t, (batch, configs["input_dim"]), jnp.float32)

    logprobs, sdomains, tdomains = mdanet_forward(prepared, sinputs, tinputs)
    jax.block_until_ready((logprobs, sdomains, tdomains))

    # Tight check against a bf16-matmul reference (same numerics as kernel).
    ref_lp, ref_sd, ref_td = _reference_forward(params, sinputs, tinputs,
                                                bf16_matmul=True)
    for got, want in zip(logprobs + sdomains + tdomains, ref_lp + ref_sd + ref_td):
        assert got.shape == want.shape, (got.shape, want.shape)
        assert bool(jnp.max(jnp.abs(got - want)) < 2e-3), "mismatch vs bf16 reference"

    # Loose check against the full-f32 reference (module semantics).
    ref_lp, ref_sd, ref_td = _reference_forward(params, sinputs, tinputs)
    for got, want in zip(logprobs + sdomains + tdomains, ref_lp + ref_sd + ref_td):
        assert bool(jnp.max(jnp.abs(got - want)) < 5e-2), "mismatch vs f32 reference"

    # Sanity: log_softmax rows sum (in prob space) to ~1.
    for arr in logprobs + sdomains + tdomains:
        row_sums = jnp.sum(jnp.exp(arr), axis=1)
        assert bool(jnp.all(jnp.abs(row_sums - 1.0) < 1e-3)), "log_softmax check failed"

    print("KERNEL_OK")
</pallas_src>

<mosaic_0001>
module attributes {stable_mosaic.version = 11 : i64} {
  func.func @kernel(%arg0: i32, %arg1: memref<16x32xf32, #tpu.memory_space<vmem>>, %arg2: memref<32x128xbf16, #tpu.memory_space<vmem>>, %arg3: memref<1x128xf32, #tpu.memory_space<vmem>>, %arg4: memref<128x128xbf16, #tpu.memory_space<vmem>>, %arg5: memref<1x128xf32, #tpu.memory_space<vmem>>, %arg6: memref<128x128xbf16, #tpu.memory_space<vmem>>, %arg7: memref<1x128xf32, #tpu.memory_space<vmem>>, %arg8: memref<128x128xf32, #tpu.memory_space<vmem>>, %arg9: memref<128x128xf32, #tpu.memory_space<vmem>>, %arg10: memref<16x128xf32, #tpu.memory_space<vmem>>) attributes {dimension_semantics = [#tpu.dimension_semantics<parallel>], iteration_bounds = array<i64: 2>, scalar_prefetch = 0 : i64, scratch_operands = 0 : i64, tpu.core_type = #tpu.core_type<tc>, window_params = [{transform_indices = @transform_0, window_bounds = array<i64: 16, 32>}, {pipeline_mode = #tpu.pipeline_mode<synchronous>, transform_indices = @transform_1, window_bounds = array<i64: 32, 128>}, {pipeline_mode = #tpu.pipeline_mode<synchronous>, transform_indices = @transform_2, window_bounds = array<i64: 1, 128>}, {pipeline_mode = #tpu.pipeline_mode<synchronous>, transform_indices = @transform_3, window_bounds = array<i64: 128, 128>}, {pipeline_mode = #tpu.pipeline_mode<synchronous>, transform_indices = @transform_4, window_bounds = array<i64: 1, 128>}, {pipeline_mode = #tpu.pipeline_mode<synchronous>, transform_indices = @transform_5, window_bounds = array<i64: 128, 128>}, {pipeline_mode = #tpu.pipeline_mode<synchronous>, transform_indices = @transform_6, window_bounds = array<i64: 1, 128>}, {pipeline_mode = #tpu.pipeline_mode<synchronous>, transform_indices = @transform_7, window_bounds = array<i64: 128, 128>}, {pipeline_mode = #tpu.pipeline_mode<synchronous>, transform_indices = @transform_8, window_bounds = array<i64: 128, 128>}, {transform_indices = @transform_9, window_bounds = array<i64: 16, 128>}]} {
    %c0 = arith.constant 0 : index
    %c0_0 = arith.constant 0 : index
    %0 = vector.load %arg1[%c0, %c0_0] : memref<16x32xf32, #tpu.memory_space<vmem>>, vector<16x32xf32>
    %c0_1 = arith.constant 0 : index
    %c0_2 = arith.constant 0 : index
    %1 = vector.load %arg2[%c0_1, %c0_2] : memref<32x128xbf16, #tpu.memory_space<vmem>>, vector<32x128xbf16>
    %c0_3 = arith.constant 0 : index
    %c0_4 = arith.constant 0 : index
    %2 = vector.load %arg3[%c0_3, %c0_4] : memref<1x128xf32, #tpu.memory_space<vmem>>, vector<1x128xf32>
    %3 = arith.truncf %0 : vector<16x32xf32> to vector<16x32xbf16>
    %cst = arith.constant dense<0.000000e+00> : vector<16x128xf32>
    %4 = tpu.matmul %3, %1, %cst {dimension_numbers = #tpu.dot_dimension_numbers<[1], [0], [0], [1], [0, 0, 1, 1], [], []>} : vector<16x32xbf16>, vector<32x128xbf16>, vector<16x128xf32> -> vector<16x128xf32>
    %5 = vector.broadcast %2 : vector<1x128xf32> to vector<16x128xf32>
    %6 = arith.addf %4, %5 : vector<16x128xf32>
    %cst_5 = arith.constant 0.000000e+00 : f32
    %7 = vector.broadcast %cst_5 : f32 to vector<16x128xf32>
    %8 = arith.maximumf %6, %7 : vector<16x128xf32>
    %c0_6 = arith.constant 0 : index
    %c0_7 = arith.constant 0 : index
    %9 = vector.load %arg4[%c0_6, %c0_7] : memref<128x128xbf16, #tpu.memory_space<vmem>>, vector<128x128xbf16>
    %c0_8 = arith.constant 0 : index
    %c0_9 = arith.constant 0 : index
    %10 = vector.load %arg5[%c0_8, %c0_9] : memref<1x128xf32, #tpu.memory_space<vmem>>, vector<1x128xf32>
    %11 = arith.truncf %8 : vector<16x128xf32> to vector<16x128xbf16>
    %cst_10 = arith.constant dense<0.000000e+00> : vector<16x128xf32>
    %12 = tpu.matmul %11, %9, %cst_10 {dimension_numbers = #tpu.dot_dimension_numbers<[1], [0], [0], [1], [0, 0, 1, 1], [], []>} : vector<16x128xbf16>, vector<128x128xbf16>, vector<16x128xf32> -> vector<16x128xf32>
    %13 = vector.broadcast %10 : vector<1x128xf32> to vector<16x128xf32>
    %14 = arith.addf %12, %13 : vector<16x128xf32>
    %cst_11 = arith.constant 0.000000e+00 : f32
    %15 = vector.broadcast %cst_11 : f32 to vector<16x128xf32>
    %16 = arith.maximumf %14, %15 : vector<16x128xf32>
    %c0_12 = arith.constant 0 : index
    %c0_13 = arith.constant 0 : index
    %17 = vector.load %arg6[%c0_12, %c0_13] : memref<128x128xbf16, #tpu.memory_space<vmem>>, vector<128x128xbf16>
    %c0_14 = arith.constant 0 : index
    %c0_15 = arith.constant 0 : index
    %18 = vector.load %arg7[%c0_14, %c0_15] : memref<1x128xf32, #tpu.memory_space<vmem>>, vector<1x128xf32>
    %19 = arith.truncf %16 : vector<16x128xf32> to vector<16x128xbf16>
    %cst_16 = arith.constant dense<0.000000e+00> : vector<16x128xf32>
    %20 = tpu.matmul %19, %17, %cst_16 {dimension_numbers = #tpu.dot_dimension_numbers<[1], [0], [0], [1], [0, 0, 1, 1], [], []>} : vector<16x128xbf16>, vector<128x128xbf16>, vector<16x128xf32> -> vector<16x128xf32>
    %21 = vector.broadcast %18 : vector<1x128xf32> to vector<16x128xf32>
    %22 = arith.addf %20, %21 : vector<16x128xf32>
    %23 = tpu.iota {dimensions = array<i32: 1>} : vector<16x128xi32>
    %cst_17 = arith.constant 0.000000e+00 : f32
    %24 = vector.broadcast %cst_17 : f32 to vector<16x128xf32>
    %c0_i32 = arith.constant 0 : i32
    %25 = vector.broadcast %c0_i32 : i32 to vector<16x128xi32>
    %26 = arith.cmpi sge, %23, %25 : vector<16x128xi32>
    %c4_i32 = arith.constant 4 : i32
    %27 = vector.broadcast %c4_i32 : i32 to vector<16x128xi32>
    %28 = arith.cmpi slt, %23, %27 : vector<16x128xi32>
    %29 = arith.andi %26, %28 : vector<16x128xi1>
    %cst_18 = arith.constant -1.000000e+30 : f32
    %30 = vector.broadcast %cst_18 : f32 to vector<16x128xf32>
    %31 = arith.select %29, %22, %30 : vector<16x128xi1>, vector<16x128xf32>
    %cst_19 = arith.constant dense<0xFF800000> : vector<16xf32>
    %32 = vector.multi_reduction <maximumf>, %31, %cst_19 [1] : vector<16x128xf32> to vector<16xf32>
    %33 = vector.shape_cast %32 : vector<16xf32> to vector<16x1xf32>
    %34 = vector.shape_cast %33 : vector<16x1xf32> to vector<16x1xf32>
    %35 = vector.broadcast %34 : vector<16x1xf32> to vector<16x128xf32>
    %36 = arith.select %29, %35, %24 : vector<16x128xi1>, vector<16x128xf32>
    %c4_i32_20 = arith.constant 4 : i32
    %37 = vector.broadcast %c4_i32_20 : i32 to vector<16x128xi32>
    %38 = arith.cmpi sge, %23, %37 : vector<16x128xi32>
    %c6_i32 = arith.constant 6 : i32
    %39 = vector.broadcast %c6_i32 : i32 to vector<16x128xi32>
    %40 = arith.cmpi slt, %23, %39 : vector<16x128xi32>
    %41 = arith.andi %38, %40 : vector<16x128xi1>
    %cst_21 = arith.constant -1.000000e+30 : f32
    %42 = vector.broadcast %cst_21 : f32 to vector<16x128xf32>
    %43 = arith.select %41, %22, %42 : vector<16x128xi1>, vector<16x128xf32>
    %cst_22 = arith.constant dense<0xFF800000> : vector<16xf32>
    %44 = vector.multi_reduction <maximumf>, %43, %cst_22 [1] : vector<16x128xf32> to vector<16xf32>
    %45 = vector.shape_cast %44 : vector<16xf32> to vector<16x1xf32>
    %46 = vector.shape_cast %45 : vector<16x1xf32> to vector<16x1xf32>
    %47 = vector.broadcast %46 : vector<16x1xf32> to vector<16x128xf32>
    %48 = arith.select %41, %47, %36 : vector<16x128xi1>, vector<16x128xf32>
    %c6_i32_23 = arith.constant 6 : i32
    %49 = vector.broadcast %c6_i32_23 : i32 to vector<16x128xi32>
    %50 = arith.cmpi sge, %23, %49 : vector<16x128xi32>
    %c8_i32 = arith.constant 8 : i32
    %51 = vector.broadcast %c8_i32 : i32 to vector<16x128xi32>
    %52 = arith.cmpi slt, %23, %51 : vector<16x128xi32>
    %53 = arith.andi %50, %52 : vector<16x128xi1>
    %cst_24 = arith.constant -1.000000e+30 : f32
    %54 = vector.broadcast %cst_24 : f32 to vector<16x128xf32>
    %55 = arith.select %53, %22, %54 : vector<16x128xi1>, vector<16x128xf32>
    %cst_25 = arith.constant dense<0xFF800000> : vector<16xf32>
    %56 = vector.multi_reduction <maximumf>, %55, %cst_25 [1] : vector<16x128xf32> to vector<16xf32>
    %57 = vector.shape_cast %56 : vector<16xf32> to vector<16x1xf32>
    %58 = vector.shape_cast %57 : vector<16x1xf32> to vector<16x1xf32>
    %59 = vector.broadcast %58 : vector<16x1xf32> to vector<16x128xf32>
    %60 = arith.select %53, %59, %48 : vector<16x128xi1>, vector<16x128xf32>
    %61 = arith.subf %22, %60 : vector<16x128xf32>
    %62 = math.exp %61 : vector<16x128xf32>
    %c0_26 = arith.constant 0 : index
    %c0_27 = arith.constant 0 : index
    %63 = vector.load %arg8[%c0_26, %c0_27] : memref<128x128xf32, #tpu.memory_space<vmem>>, vector<128x128xf32>
    %cst_28 = arith.constant dense<0.000000e+00> : vector<16x128xf32>
    %64 = tpu.matmul %62, %63, %cst_28 {dimension_numbers = #tpu.dot_dimension_numbers<[1], [0], [0], [1], [0, 0, 1, 1], [], []>} : vector<16x128xf32>, vector<128x128xf32>, vector<16x128xf32> -> vector<16x128xf32>
    %65 = tpu.iota {dimensions = array<i32: 1>} : vector<16x128xi32>
    %c3_i32 = arith.constant 3 : i32
    %66 = vector.broadcast %c3_i32 : i32 to vector<16x128xi32>
    %67 = arith.cmpi slt, %65, %66 : vector<16x128xi32>
    %cst_29 = arith.constant 1.000000e+00 : f32
    %68 = vector.broadcast %cst_29 : f32 to vector<16x128xf32>
    %69 = arith.select %67, %64, %68 : vector<16x128xi1>, vector<16x128xf32>
    %70 = math.log %69 : vector<16x128xf32>
    %c0_30 = arith.constant 0 : index
    %c0_31 = arith.constant 0 : index
    %71 = vector.load %arg9[%c0_30, %c0_31] : memref<128x128xf32, #tpu.memory_space<vmem>>, vector<128x128xf32>
    %cst_32 = arith.constant dense<0.000000e+00> : vector<16x128xf32>
    %72 = tpu.matmul %70, %71, %cst_32 {dimension_numbers = #tpu.dot_dimension_numbers<[1], [0], [0], [1], [0, 0, 1, 1], [], []>} : vector<16x128xf32>, vector<128x128xf32>, vector<16x128xf32> -> vector<16x128xf32>
    %c8_i32_33 = arith.constant 8 : i32
    %73 = vector.broadcast %c8_i32_33 : i32 to vector<16x128xi32>
    %74 = arith.cmpi slt, %23, %73 : vector<16x128xi32>
    %75 = arith.subf %22, %60 : vector<16x128xf32>
    %76 = arith.subf %75, %72 : vector<16x128xf32>
    %cst_34 = arith.constant 0.000000e+00 : f32
    %77 = vector.broadcast %cst_34 : f32 to vector<16x128xf32>
    %78 = arith.select %74, %76, %77 : vector<16x128xi1>, vector<16x128xf32>
    %c0_35 = arith.constant 0 : index
    %c0_36 = arith.constant 0 : index
    %79 = vector.load %arg10[%c0_35, %c0_36] : memref<16x128xf32, #tpu.memory_space<vmem>>, vector<16x128xf32>
    tpu.vector_store %arg10[%c0_35, %c0_36], %78 {strides = array<i32>} : memref<16x128xf32, #tpu.memory_space<vmem>>, vector<16x128xf32>,
    return
  }
  func.func @transform_0(%arg0: i32) -> (i32, i32) {
    %c0_i32 = arith.constant 0 : i32
    %c0_i32_0 = arith.constant 0 : i32
    return %arg0, %c0_i32 : i32, i32
  }
  func.func @transform_1(%arg0: i32) -> (i32, i32) {
    %c0_i32 = arith.constant 0 : i32
    %c0_i32_0 = arith.constant 0 : i32
    %c0_i32_1 = arith.constant 0 : i32
    return %c0_i32, %c0_i32_0 : i32, i32
  }
  func.func @transform_2(%arg0: i32) -> (i32, i32) {
    %c0_i32 = arith.constant 0 : i32
    %c0_i32_0 = arith.constant 0 : i32
    %c0_i32_1 = arith.constant 0 : i32
    return %c0_i32, %c0_i32_0 : i32, i32
  }
  func.func @transform_3(%arg0: i32) -> (i32, i32) {
    %c0_i32 = arith.constant 0 : i32
    %c0_i32_0 = arith.constant 0 : i32
    %c0_i32_1 = arith.constant 0 : i32
    return %c0_i32, %c0_i32_0 : i32, i32
  }
  func.func @transform_4(%arg0: i32) -> (i32, i32) {
    %c0_i32 = arith.constant 0 : i32
    %c0_i32_0 = arith.constant 0 : i32
    %c0_i32_1 = arith.constant 0 : i32
    return %c0_i32, %c0_i32_0 : i32, i32
  }
  func.func @transform_5(%arg0: i32) -> (i32, i32) {
    %c0_i32 = arith.constant 0 : i32
    %c0_i32_0 = arith.constant 0 : i32
    %c0_i32_1 = arith.constant 0 : i32
    return %c0_i32, %c0_i32_0 : i32, i32
  }
  func.func @transform_6(%arg0: i32) -> (i32, i32) {
    %c0_i32 = arith.constant 0 : i32
    %c0_i32_0 = arith.constant 0 : i32
    %c0_i32_1 = arith.constant 0 : i32
    return %c0_i32, %c0_i32_0 : i32, i32
  }
  func.func @transform_7(%arg0: i32) -> (i32, i32) {
    %c0_i32 = arith.constant 0 : i32
    %c0_i32_0 = arith.constant 0 : i32
    %c0_i32_1 = arith.constant 0 : i32
    return %c0_i32, %c0_i32_0 : i32, i32
  }
  func.func @transform_8(%arg0: i32) -> (i32, i32) {
    %c0_i32 = arith.constant 0 : i32
    %c0_i32_0 = arith.constant 0 : i32
    %c0_i32_1 = arith.constant 0 : i32
    return %c0_i32, %c0_i32_0 : i32, i32
  }
  func.func @transform_9(%arg0: i32) -> (i32, i32) {
    %c0_i32 = arith.constant 0 : i32
    %c0_i32_0 = arith.constant 0 : i32
    return %arg0, %c0_i32 : i32, i32
  }
}

</mosaic_0001>

<bundles_post_ra>
// kernel: _forward_impl.1
= control target key start
LH: loop header
LB: loop body
LE: loop exit
PB: predicated region body
PF: predicated region fallthrough
CT: control target
= control target key end

     0   :  { %14 = vsyncpa [#allocation3], 0  ;;  %s1946_s0 = inlined_call_operand.vmem [shape: f32[32,32], index: 0, kind: input, shape index: {}]   ;;  %s1947_s1 = inlined_call_operand.hbm [shape: bf16[32,128], index: 1, kind: input, shape index: {}]   ;;  %s1948_s2 = inlined_call_operand.hbm [shape: f32[1,128], index: 2, kind: input, shape index: {}]   ;;  %s1949_s3 = inlined_call_operand.vmem [shape: bf16[128,128], index: 3, kind: input, shape index: {}]   ;;  %s1950_s4 = inlined_call_operand.hbm [shape: f32[1,128], index: 4, kind: input, shape index: {}]   ;;  %s1951_s5 = inlined_call_operand.hbm [shape: bf16[128,128], index: 5, kind: input, shape index: {}]   ;;  %s1952_s6 = inlined_call_operand.hbm [shape: f32[1,128], index: 6, kind: input, shape index: {}]   ;;  %s1953_s7 = inlined_call_operand.hbm [shape: f32[128,128], index: 7, kind: input, shape index: {}]   ;;  %s1954_s8 = inlined_call_operand.hbm [shape: f32[128,128], index: 8, kind: input, shape index: {}]   ;;  %s1955_s9 = inlined_call_operand.vmem [shape: f32[32,128], index: 9, kind: output, shape index: {}]  }
   0x1   :  { %15 = vsyncpa [#allocation5], 0 }
   0x2   :  { %16 = vsyncpa [#allocation8], 0 }
   0x3   :  { %17 = vsyncpa [#allocation11], 0  ;;  %s1697_s30 = smov 0  }
   0x4 LB: > { %s1634_s10 = smov [#allocation4]   ;;  %s1095_s12 = sadd.s32 4294967295, %s1632_s30   ;;  %s1632_s30 = sphi %s1697_s30, %s23_s30  }
   0x5   : > { %s274_s11 = sshll.u32 %s1634_s10, 4  ;;  %p1097_p0 = scmp.ge.s32.totalorder %s1632_s30, 1  ;;  %s275_s11 = int_to_ptr.vmem [resolvable:$true] %s274_s11 }
   0x6   : > { %p248_p1 = scmp.lt.s32.totalorder %s1632_s30, 3  ;;  %p1707_p2 = scmp.eq.s32.totalorder %s1095_s12, 0 }
   0x7   : > { %s1635_s15 = smov [#allocation7]   ;;  %s1636_s18 = smov [#allocation10]  }
   0x8   : > { %s1959_s13 = scalar_select %p1707_p2, 1, 0 }
   0x9   : > { %p1711_p3 = pnand %p1097_p0, %p248_p1  ;;  %s298_s16 = sshll.u32 %s1635_s15, 4  ;;  %s1717_s16 = int_to_ptr.vmem [resolvable:$true] %s298_s16 }
   0xa   : > { %s322_s19 = sshll.u32 %s1636_s18, 4  ;;  %s1439_s21 = scalar_lea.vmem %s275_s11, 16  ;;  %s1725_s19 = int_to_ptr.vmem [resolvable:$true] %s322_s19 }
   0xb   : > { %s1960_s14 = scalar_select %p1711_p3, 1, 0 }
   0xc   : > { %p1345_p4 = pneg %p1711_p3  ;;  %p1440_p7 = scmp.ne.s32.totalorder %s275_s11, %s1439_s21 }
   0xd   : > { %s1446_s22 = scalar_lea.vmem %s275_s11, 32  ;;  %p1447_p10 = scmp.lt.s32.totalorder %s275_s11, %s275_s11 }
   0xe   : > { %p1721_p5 = pnand %p1707_p2, %p1345_p4  ;;  %p1448_p11 = scmp.lt.s32.totalorder %s1446_s22, %s1439_s21 }
  0x10   : > { %p1729_p6 = pneg %p1721_p5  ;;  %p1449_p12 = por %p1448_p11, %p1447_p10 }
  0x12   : > { %p1442_p8 = pnand %p1440_p7, %p1729_p6 }
  0x14   : > { %p1443_p9 = pneg %p1442_p8 }
  0x16   : > { %p1450_p13 = pnand %p1449_p12, %p1443_p9 }
  0x18   : > { %1453 = shalt.err (!%p1450_p13)
}
  0x19   : > { %1351 = dma.hbm_to_vmem [thread:$0]  (!%p1721_p5), %s1948_s2, 16, %s275_s11, [#allocation5]  }
  0x1a   : > { %s1465_s25 = scalar_lea.vmem %s1717_s16, 1024  ;;  %p1473_p7 = scmp.lt.s32.totalorder %s1717_s16, %s1717_s16 }
  0x1b   : > { %p1466_p0 = scmp.ne.s32.totalorder %s1717_s16, %s1465_s25  ;;  %p1474_p8 = scmp.lt.s32.totalorder %s1465_s25, %s1465_s25 }
  0x1d   : > { %p1468_p1 = pnand %p1466_p0, %p1729_p6  ;;  %p1475_p9 = por %p1474_p8, %p1473_p7 }
  0x1f   : > { %p1469_p4 = pneg %p1468_p1 }
  0x21   : > { %p1476_p10 = pnand %p1475_p9, %p1469_p4 }
  0x23   : > { %1479 = shalt.err (!%p1476_p10)
}
  0x24   : > { %s1637_s26 = smov 64   ;;  %s1638_s27 = smov 4  }
  0x25   : > { %1357 = dma.hbm_to_vmem [thread:$0]  (!%p1721_p5), %s1951_s5, 1024, %s1717_s16, [#allocation8], %s1637_s26, %s1637_s26, %s1638_s27  }
  0x26   : > { %s1491_s10 = scalar_lea.vmem %s1725_s19, 2048  ;;  %p1499_p0 = scmp.lt.s32.totalorder %s1725_s19, %s1725_s19 }
  0x27   : > { %p1492_p11 = scmp.ne.s32.totalorder %s1725_s19, %s1491_s10  ;;  %p1500_p1 = scmp.lt.s32.totalorder %s1491_s10, %s1491_s10 }
  0x29   : > { %p1494_p12 = pnand %p1492_p11, %p1729_p6  ;;  %p1501_p4 = por %p1500_p1, %p1499_p0 }
  0x2b   : > { %p1495_p13 = pneg %p1494_p12 }
  0x2d   : > { %p1502_p7 = pnand %p1501_p4, %p1495_p13 }
  0x2f   : > { %1505 = shalt.err (!%p1502_p7)
}
  0x30   : > { %s1639_s11 = smov 128   ;;  %s1640_s15 = smov 8  }
  0x31   : > { %1363 = dma.hbm_to_vmem [thread:$0]  (!%p1721_p5), %s1953_s7, 2048, %s1725_s19, [#allocation11], %s1639_s11, %s1639_s11, %s1640_s15  }
  0x32   : > { %s1641_s21 = smov [#allocation2]   ;;  %s1642_s23 = smov [#allocation6]  }
  0x33   : > { %s260_s22 = sshll.u32 %s1641_s21, 4  ;;  %s288_s24 = sshll.u32 %s1642_s23, 4  ;;  %s261_s22 = int_to_ptr.vmem [resolvable:$true] %s260_s22  ;;  %s289_s24 = int_to_ptr.vmem [resolvable:$true] %s288_s24 }
  0x34   : > { %s1517_s25 = scalar_lea.vmem %s261_s22, 256  ;;  %p1525_p11 = scmp.lt.s32.totalorder %s261_s22, %s261_s22 }
  0x35   : > { %p1518_p8 = scmp.ne.s32.totalorder %s261_s22, %s1517_s25  ;;  %p1526_p12 = scmp.lt.s32.totalorder %s1517_s25, %s1517_s25 }
  0x37   : > { %p1520_p9 = pnand %p1518_p8, %p1729_p6  ;;  %p1527_p13 = por %p1526_p12, %p1525_p11 }
  0x39   : > { %p1521_p10 = pneg %p1520_p9 }
  0x3b   : > { %p1528_p0 = pnand %p1527_p13, %p1521_p10 }
  0x3d   : > { %1531 = shalt.err (!%p1528_p0)
}
  0x3e   : > { %1348 = dma.hbm_to_vmem [thread:$0]  (!%p1721_p5), %s1947_s1, 256, %s261_s22, [#allocation3], %s1637_s26, %s1637_s26, %s1638_s27  }
  0x3f   : > { %s1543_s29 = scalar_lea.vmem %s289_s24, 16  ;;  %s1550_s10 = scalar_lea.vmem %s289_s24, 32 }
  0x40   : > { %p1544_p1 = scmp.ne.s32.totalorder %s289_s24, %s1543_s29  ;;  %p1551_p8 = scmp.lt.s32.totalorder %s289_s24, %s289_s24 }
  0x41   : > { %p1552_p9 = scmp.lt.s32.totalorder %s1550_s10, %s1543_s29 }
  0x42   : > { %p1546_p4 = pnand %p1544_p1, %p1729_p6 }
  0x43   : > { %p1553_p10 = por %p1552_p9, %p1551_p8 }
  0x44   : > { %p1547_p7 = pneg %p1546_p4 }
  0x46   : > { %p1554_p11 = pnand %p1553_p10, %p1547_p7 }
  0x48   : > { %1557 = shalt.err (!%p1554_p11)
}
  0x49   : > { %1354 = dma.hbm_to_vmem [thread:$0]  (!%p1721_p5), %s1950_s4, 16, %s289_s24, [#allocation5]  }
  0x4a   : > { %s1643_s21 = smov [#allocation9]   ;;  %s1644_s27 = smov [#allocation12]  }
  0x4b   : > { %s312_s26 = sshll.u32 %s1643_s21, 4  ;;  %s335_s22 = sshll.u32 %s1644_s27, 4  ;;  %s313_s26 = int_to_ptr.vmem [resolvable:$true] %s312_s26  ;;  %s336_s22 = int_to_ptr.vmem [resolvable:$true] %s335_s22 }
  0x4c   : > { %s1569_s23 = scalar_lea.vmem %s313_s26, 16  ;;  %s1576_s25 = scalar_lea.vmem %s313_s26, 32 }
  0x4d   : > { %p1570_p12 = scmp.ne.s32.totalorder %s313_s26, %s1569_s23  ;;  %p1577_p1 = scmp.lt.s32.totalorder %s313_s26, %s313_s26 }
  0x4e   : > { %p1578_p4 = scmp.lt.s32.totalorder %s1576_s25, %s1569_s23 }
  0x4f   : > { %p1572_p13 = pnand %p1570_p12, %p1729_p6 }
  0x50   : > { %p1579_p7 = por %p1578_p4, %p1577_p1 }
  0x51   : > { %p1573_p0 = pneg %p1572_p13 }
  0x53   : > { %p1580_p8 = pnand %p1579_p7, %p1573_p0 }
  0x55   : > { %1583 = shalt.err (!%p1580_p8)
}
  0x56   : > { %1360 = dma.hbm_to_vmem [thread:$0]  (!%p1721_p5), %s1952_s6, 16, %s313_s26, [#allocation8]  }
  0x57   : > { %s1595_s28 = scalar_lea.vmem %s336_s22, 2048  ;;  %p1603_p12 = scmp.lt.s32.totalorder %s336_s22, %s336_s22 }
  0x58   : > { %p1596_p9 = scmp.ne.s32.totalorder %s336_s22, %s1595_s28  ;;  %p1604_p13 = scmp.lt.s32.totalorder %s1595_s28, %s1595_s28 }
  0x5a   : > { %p1598_p10 = pnand %p1596_p9, %p1729_p6  ;;  %p1605_p2 = por %p1604_p13, %p1603_p12 }
  0x5c   : > { %p1599_p11 = pneg %p1598_p10 }
  0x5e   : > { %p1606_p3 = pnand %p1605_p2, %p1599_p11 }
  0x60   : > { %1609 = shalt.err (!%p1606_p3)
}
  0x61   : > { %1366 = dma.hbm_to_vmem [thread:$0]  (!%p1721_p5), %s1954_s8, 2048, %s336_s22, [#allocation11], %s1639_s11, %s1639_s11, %s1640_s15  }
  0x62   : > { %p1963_p0 = scmp.ne.s32.totalorder %s1960_s14, 0 }
  0x63   : > { %p1964_p6 = scmp.ne.s32.totalorder (!%p1963_p0), %s1959_s13, 0 }
  0x64   : > { %360 = sbr.rel (%p1963_p0) target bundleno = 1303 (0x517), region = 56 }
  0x69   : > { %1615 = dma.done.wait (%p1964_p6), [#allocation3], 256  }
  0x6a   : > { %1617 = vsyncadd (%p1964_p6), [#allocation3], 4294967040 }
  0x6b   : > { %1619 = dma.done.wait (%p1964_p6), [#allocation5], 32  }
  0x6c   : > { %1621 = vsyncadd (%p1964_p6), [#allocation5], 4294967264 }
  0x6d   : > { %1623 = dma.done.wait (%p1964_p6), [#allocation8], 1040  }
  0x6e   : > { %1625 = vsyncadd (%p1964_p6), [#allocation8], 4294966256 }
  0x6f   : > { %1627 = dma.done.wait (%p1964_p6), [#allocation11], 4096  }
  0x70   : > { %1629 = vsyncadd (%p1964_p6), [#allocation11], 4294963200  ;;  %s1114_s14 = sshll.u32 %s1095_s12, 1  ;;  %v1645_v0 = vmov 0.0   ;;  %vm1646_vm0 = vmmov 0   ;;  %v1402_v1 = vld [vmem:[#allocation2 + $0x8] sm:$0xff]   ;;  %v734_v44 = vlaneseq }
  0x71   : > { %1199 = vmatprep.subr.bf16.mxu0 %v1645_v0  ;;  %1203 = vmatprep.mubr.msk.bf16.mxu0 %vm1646_vm0, %v1645_v0  ;;  %p421_p2 = scmp.lt.s32.totalorder %s1114_s14, 3  ;;  %v1403_v2 = vld [vmem:[#allocation2] sm:$0xff]   ;;  %v1404_v5 = vld [vmem:[%s1949_s3 + $0x38] sm:$0xff]   ;;  %v1405_v7 = vld [vmem:[%s1949_s3 + $0x30] sm:$0xff]   ;;  %vm459_vm1 = vcmask 261120  }
  0x72   : > { %1207 = vmatprep.subr.bf16.mxu1 %v1645_v0  ;;  %1223 = vmatprep.mubr.msk.bf16.mxu1 %vm1646_vm0, %v1645_v0  ;;  %v1406_v8 = vld [vmem:[%s1949_s3 + $0x28] sm:$0xff]   ;;  %v1407_v9 = vld [vmem:[%s1949_s3 + $0x20] sm:$0xff]   ;;  %v1408_v10 = vld [vmem:[%s1949_s3 + $0x18] sm:$0xff]   ;;  %v1880_v45 = vand.u32 127, %v734_v44 }
  0x73   : > { %s1970_s14 = smov (!%p421_p2, %s1114_s14), 3  ;;  %1200 = vmatpush3.bf16.msra.mxu0 %v1402_v1  ;;  %1208 = vmatpush3.bf16.msra.mxu1 %v1404_v5  ;;  %v1409_v11 = vld [vmem:[%s1949_s3 + $0x10] sm:$0xff]   ;;  %v1410_v12 = vld [vmem:[%s1949_s3 + $0x8] sm:$0xff]   ;;  %v1411_v13 = vld [vmem:[%s1949_s3] sm:$0xff]  }
  0x74   : > { %s1115_s13 = sshll.u32 %s1970_s14, 3  ;;  %1201 = vmatprep.subr.bf16.mxu0 %v1645_v0  ;;  %1209 = vmatprep.subr.bf16.mxu1 %v1645_v0  ;;  %v1412_v14 = vld [vmem:[#allocation7 + $0x38] sm:$0xff]   ;;  %v1413_v15 = vld [vmem:[#allocation7 + $0x30] sm:$0xff]   ;;  %v1414_v16 = vld [vmem:[#allocation7 + $0x28] sm:$0xff]   ;;  %vm747_vm2 = vcmp.ge.s32.totalorder %v1880_v45, 4  ;;  %vm748_vm3 = vcmp.lt.s32.totalorder %v1880_v45, 6 }
  0x75   : > { %s424_s20 = scalar_lea.vmem %s1946_s0, %s1115_s13  ;;  %v1415_v17 = vld [vmem:[#allocation7 + $0x20] sm:$0xff]   ;;  %v1416_v18 = vld [vmem:[#allocation7 + $0x18] sm:$0xff]   ;;  %v1417_v29 = vld [vmem:[#allocation7 + $0x10] sm:$0xff]   ;;  %vm737_vm5 = vcmp.lt.s32.totalorder %v1880_v45, 4  ;;  %vm758_vm6 = vcmp.ge.s32.totalorder %v1880_v45, 6  ;;  %vm759_vm7 = vcmp.lt.s32.totalorder %v1880_v45, 8  ;;  %s430_s11 = scalar_lea.vmem %s1955_s9, %s1115_s13 }
  0x76   : > { %v433_v3 = vld [vmem:[%s424_s20] sm:$0xff]  ;;  %v434_v4 = vld [vmem:[%s424_s20 + $0x8] sm:$0xff]  ;;  %v1118_v19 = vld [vmem:[#allocation4] ss:$0 sm:$0xff]  ;;  %vm866_vm9 = vcmp.lt.s32.totalorder %v1880_v45, 3 }
  0x77   : > { %v440_v6 = vpack.c.bf16 %v434_v4, %v433_v3  ;;  %1202 = vmatpush3.bf16.msra.mxu0 %v1403_v2  ;;  %1210 = vmatpush3.bf16.msra.mxu1 %v1405_v7  ;;  %v1418_v30 = vld [vmem:[#allocation7 + $0x8] sm:$0xff]   ;;  %v1419_v31 = vld [vmem:[#allocation7] sm:$0xff]   ;;  %v1122_v32 = vld [vmem:[#allocation6] ss:$0 sm:$0xff] }
  0x78   : > { %1227 = vmatprep.subr.bf16.mxu0 %v1645_v0  ;;  %1211 = vmatprep.subr.bf16.mxu1 %v1645_v0  ;;  %v790_v42 = vld [vmem:[#allocation10 + $0x78] sm:$0xff]  ;;  %v789_v43 = vld [vmem:[#allocation10 + $0x70] sm:$0xff]  ;;  %vm1884_vm4 = vmand %vm747_vm2, %vm748_vm3 }
  0x79   : > { %v1131_v46 = vld [vmem:[#allocation9] ss:$0 sm:$0xff]  ;;  %vm1909_vm8 = vmand %vm758_vm6, %vm759_vm7  ;;  %v788_v61 = vld [vmem:[#allocation10 + $0x68] sm:$0xff] }
  0x7a   : > { %1204 = vmatmul.mubr.msk.bf16.vlgmr.msra.gmra.mxu0 %vm459_vm1, %v440_v6  ;;  %v787_v62 = vld [vmem:[#allocation10 + $0x60] sm:$0xff]  ;;  %v786_v63 = vld [vmem:[#allocation10 + $0x58] sm:$0xff]  ;;  %v784_v1 = vld [vmem:[#allocation10 + $0x48] sm:$0xff] }
  0x7b   : > { %1243 = vmatprep.mubr.msk.bf16.mxu0 %vm1646_vm0, %v1645_v0  ;;  %1212 = vmatpush3.bf16.msra.mxu1 %v1406_v8  ;;  %v783_v2 = vld [vmem:[#allocation10 + $0x40] sm:$0xff]  ;;  %v782_v3 = vld [vmem:[#allocation10 + $0x38] sm:$0xff]  ;;  %v781_v4 = vld [vmem:[#allocation10 + $0x30] sm:$0xff] }
  0x7c   : > { %1213 = vmatprep.subr.bf16.mxu1 %v1645_v0  ;;  %1228 = vmatpush3.bf16.msra.mxu0 %v1412_v14  ;;  %v780_v5 = vld [vmem:[#allocation10 + $0x28] sm:$0xff]  ;;  %v779_v6 = vld [vmem:[#allocation10 + $0x20] sm:$0xff]  ;;  %v778_v7 = vld [vmem:[#allocation10 + $0x18] sm:$0xff] }
  0x7d   : > { %1229 = vmatprep.subr.bf16.mxu0 %v1645_v0  ;;  %v777_v8 = vld [vmem:[#allocation10 + $0x10] sm:$0xff]  ;;  %v885_v14 = vld [vmem:[#allocation12 + $0x60] sm:$0xff] }
  0x7e   : > { %v873_v44 = vld [vmem:[#allocation12] sm:$0xff] }
  0x7f   : > { %1214 = vmatpush3.bf16.msra.mxu1 %v1407_v9  ;;  %v776_v9 = vld [vmem:[#allocation10 + $0x8] sm:$0xff] }
  0x80   : > { %1215 = vmatprep.subr.bf16.mxu1 %v1645_v0  ;;  %1230 = vmatpush3.bf16.msra.mxu0 %v1413_v15  ;;  %v884_v15 = vld [vmem:[#allocation12 + $0x58] sm:$0xff] }
  0x81   : > { %1231 = vmatprep.subr.bf16.mxu0 %v1645_v0 }
  0x83   : > { %1216 = vmatpush3.bf16.msra.mxu1 %v1408_v10  ;;  %v775_v10 = vld [vmem:[#allocation10] sm:$0xff] }
  0x84   : > { %1217 = vmatprep.subr.bf16.mxu1 %v1645_v0  ;;  %1232 = vmatpush3.bf16.msra.mxu0 %v1414_v16  ;;  %v883_v16 = vld [vmem:[#allocation12 + $0x50] sm:$0xff] }
  0x85   : > { %1233 = vmatprep.subr.bf16.mxu0 %v1645_v0 }
  0x87   : > { %1218 = vmatpush3.bf16.msra.mxu1 %v1409_v11  ;;  %v888_v11 = vld [vmem:[#allocation12 + $0x78] sm:$0xff] }
  0x88   : > { %1219 = vmatprep.subr.bf16.mxu1 %v1645_v0  ;;  %1234 = vmatpush3.bf16.msra.mxu0 %v1415_v17 }
  0x89   : > { %1235 = vmatprep.subr.bf16.mxu0 %v1645_v0 }
  0x8b   : > { %1220 = vmatpush3.bf16.msra.mxu1 %v1410_v12  ;;  %v887_v12 = vld [vmem:[#allocation12 + $0x70] sm:$0xff] }
  0x8c   : > { %1221 = vmatprep.subr.bf16.mxu1 %v1645_v0  ;;  %1236 = vmatpush3.bf16.msra.mxu0 %v1416_v18 }
  0x8d   : > { %1237 = vmatprep.subr.bf16.mxu0 %v1645_v0 }
  0x8f   : > { %1222 = vmatpush3.bf16.msra.mxu1 %v1411_v13  ;;  %v886_v13 = vld [vmem:[#allocation12 + $0x68] sm:$0xff] }
  0x90   : > { %1238 = vmatpush3.bf16.msra.mxu0 %v1417_v29  ;;  %1247 = vmatprep.subr.mxu1 %v790_v42 }
  0x91   : > { %1239 = vmatprep.subr.bf16.mxu0 %v1645_v0 }
  0x94   : > { %1240 = vmatpush3.bf16.msra.mxu0 %v1418_v30 }
  0x95   : > { %1241 = vmatprep.subr.bf16.mxu0 %v1645_v0  ;;  %v785_v0 = vld [vmem:[#allocation10 + $0x50] sm:$0xff] }
  0x98   : > { %1242 = vmatpush3.bf16.msra.mxu0 %v1419_v31 }
  0x99   : > { %1282 = vmatprep.subr.mxu0 %v888_v11 }
 0x13a   : > { %v497_v20 = vpop.f32.mrf.mxu0 }
 0x13b   : > { %v498_v22 = vadd.f32 %v1118_v19, %v497_v20 }
 0x13c   : > { %v1205_v21 = vpop.f32.mrf.mxu0 }
 0x13d   : > { %v504_v26 = vmax.f32 %v498_v22, 0.0 }
 0x13e   : > { %v500_v23 = vpop.f32.mrf.mxu0 }
 0x13f   : > { %v501_v24 = vadd.f32 %v1118_v19, %v500_v23 }
 0x140   : > { %v1206_v25 = vpop.f32.mrf.mxu0 }
 0x141   : > { %v505_v27 = vmax.f32 %v501_v24, 0.0 }
 0x143   : > { %v523_v28 = vpack.c.bf16 %v505_v27, %v504_v26 }
 0x145   : > { %1224 = vmatmul.mubr.bf16.vlgmr.msra.gmra.mxu1 %v523_v28 }
 0x146   : > { %1248 = vmatpush3.msra.mxu1 %v790_v42  ;;  %v875_v42 = vld [vmem:[#allocation12 + $0x10] sm:$0xff] }
 0x147   : > { %1249 = vmatprep.subr.mxu1 %v789_v43 }
 0x148   : > { %1250 = vmatpush3.msra.mxu1 %v789_v43  ;;  %v874_v43 = vld [vmem:[#allocation12 + $0x8] sm:$0xff] }
 0x149   : > { %1251 = vmatprep.subr.mxu1 %v788_v61 }
 0x14a   : > { %1252 = vmatpush3.msra.mxu1 %v788_v61 }
 0x14b   : > { %1253 = vmatprep.subr.mxu1 %v787_v62 }
 0x14c   : > { %1254 = vmatpush3.msra.mxu1 %v787_v62 }
 0x14d   : > { %1255 = vmatprep.subr.mxu1 %v786_v63 }
 0x14e   : > { %1256 = vmatpush3.msra.mxu1 %v786_v63 }
 0x14f   : > { %1257 = vmatprep.subr.mxu1 %v785_v0 }
 0x150   : > { %1258 = vmatpush3.msra.mxu1 %v785_v0 }
 0x151   : > { %1259 = vmatprep.subr.mxu1 %v784_v1 }
 0x152   : > { %1260 = vmatpush3.msra.mxu1 %v784_v1 }
 0x153   : > { %1261 = vmatprep.subr.mxu1 %v783_v2 }
 0x154   : > { %1262 = vmatpush3.msra.mxu1 %v783_v2 }
 0x155   : > { %1263 = vmatprep.subr.mxu1 %v782_v3 }
 0x156   : > { %1264 = vmatpush3.msra.mxu1 %v782_v3 }
 0x157   : > { %1265 = vmatprep.subr.mxu1 %v781_v4 }
 0x158   : > { %1266 = vmatpush3.msra.mxu1 %v781_v4 }
 0x159   : > { %1267 = vmatprep.subr.mxu1 %v780_v5 }
 0x15a   : > { %1268 = vmatpush3.msra.mxu1 %v780_v5 }
 0x15b   : > { %1269 = vmatprep.subr.mxu1 %v779_v6 }
 0x15c   : > { %1270 = vmatpush3.msra.mxu1 %v779_v6 }
 0x15d   : > { %1271 = vmatprep.subr.mxu1 %v778_v7 }
 0x15e   : > { %1272 = vmatpush3.msra.mxu1 %v778_v7 }
 0x15f   : > { %1273 = vmatprep.subr.mxu1 %v777_v8 }
 0x160   : > { %1274 = vmatpush3.msra.mxu1 %v777_v8 }
 0x161   : > { %1275 = vmatprep.subr.mxu1 %v776_v9 }
 0x162   : > { %1276 = vmatpush3.msra.mxu1 %v776_v9 }
 0x163   : > { %1277 = vmatprep.subr.mxu1 %v775_v10 }
 0x164   : > { %1278 = vmatpush3.msra.mxu1 %v775_v10 }
 0x205   : > { %v612_v33 = vpop.f32.mrf.mxu1 }
 0x206   : > { %v613_v35 = vadd.f32 %v1122_v32, %v612_v33 }
 0x207   : > { %v1225_v34 = vpop.f32.mrf.mxu1 }
 0x208   : > { %v619_v39 = vmax.f32 %v613_v35, 0.0  ;;  %v882_v35 = vld [vmem:[#allocation12 + $0x48] sm:$0xff] }
 0x209   : > { %v615_v36 = vpop.f32.mrf.mxu1 }
 0x20a   : > { %v616_v37 = vadd.f32 %v1122_v32, %v615_v36  ;;  %v881_v36 = vld [vmem:[#allocation12 + $0x40] sm:$0xff] }
 0x20b   : > { %v1226_v38 = vpop.f32.mrf.mxu1 }
 0x20c   : > { %v620_v40 = vmax.f32 %v616_v37, 0.0  ;;  %v880_v37 = vld [vmem:[#allocation12 + $0x38] sm:$0xff]  ;;  %v879_v38 = vld [vmem:[#allocation12 + $0x30] sm:$0xff] }
 0x20e   : > { %v638_v41 = vpack.c.bf16 %v620_v40, %v619_v39  ;;  %v878_v39 = vld [vmem:[#allocation12 + $0x28] sm:$0xff]  ;;  %v877_v40 = vld [vmem:[#allocation12 + $0x20] sm:$0xff] }
 0x210   : > { %1244 = vmatmul.mubr.bf16.vlgmr.msra.gmra.mxu0 %v638_v41  ;;  %v876_v41 = vld [vmem:[#allocation12 + $0x18] sm:$0xff] }
 0x211   : > { %1283 = vmatpush3.msra.mxu0 %v888_v11 }
 0x212   : > { %1284 = vmatprep.subr.mxu0 %v887_v12 }
 0x213   : > { %1285 = vmatpush3.msra.mxu0 %v887_v12 }
 0x214   : > { %1286 = vmatprep.subr.mxu0 %v886_v13 }
 0x215   : > { %1287 = vmatpush3.msra.mxu0 %v886_v13 }
 0x216   : > { %1288 = vmatprep.subr.mxu0 %v885_v14 }
 0x217   : > { %1289 = vmatpush3.msra.mxu0 %v885_v14 }
 0x218   : > { %1290 = vmatprep.subr.mxu0 %v884_v15 }
 0x219   : > { %1291 = vmatpush3.msra.mxu0 %v884_v15 }
 0x21a   : > { %1292 = vmatprep.subr.mxu0 %v883_v16 }
 0x21b   : > { %1293 = vmatpush3.msra.mxu0 %v883_v16 }
 0x21c   : > { %1294 = vmatprep.subr.mxu0 %v882_v35 }
 0x21d   : > { %1295 = vmatpush3.msra.mxu0 %v882_v35 }
 0x21e   : > { %1296 = vmatprep.subr.mxu0 %v881_v36 }
 0x21f   : > { %1297 = vmatpush3.msra.mxu0 %v881_v36 }
 0x220   : > { %1298 = vmatprep.subr.mxu0 %v880_v37 }
 0x221   : > { %1299 = vmatpush3.msra.mxu0 %v880_v37 }
 0x222   : > { %1300 = vmatprep.subr.mxu0 %v879_v38 }
 0x223   : > { %1301 = vmatpush3.msra.mxu0 %v879_v38 }
 0x224   : > { %1302 = vmatprep.subr.mxu0 %v878_v39 }
 0x225   : > { %1303 = vmatpush3.msra.mxu0 %v878_v39 }
 0x226   : > { %1304 = vmatprep.subr.mxu0 %v877_v40 }
 0x227   : > { %1305 = vmatpush3.msra.mxu0 %v877_v40 }
 0x228   : > { %1306 = vmatprep.subr.mxu0 %v876_v41 }
 0x229   : > { %1307 = vmatpush3.msra.mxu0 %v876_v41 }
 0x22a   : > { %1308 = vmatprep.subr.mxu0 %v875_v42 }
 0x22b   : > { %1309 = vmatpush3.msra.mxu0 %v875_v42 }
 0x22c   : > { %1310 = vmatprep.subr.mxu0 %v874_v43 }
 0x22d   : > { %1311 = vmatpush3.msra.mxu0 %v874_v43 }
 0x22e   : > { %1312 = vmatprep.subr.mxu0 %v873_v44 }
 0x22f   : > { %1313 = vmatpush3.msra.mxu0 %v873_v44 }
 0x2d0   : > { %v727_v47 = vpop.f32.mrf.mxu0 }
 0x2d1   : > { %v1889_v49 = vadd.f32 %v1131_v46, %v727_v47 }
 0x2d2   : > { %v1245_v50 = vpop.f32.mrf.mxu0 }
 0x2d3   : > { %v750_v51 = vsel %vm1884_vm4, %v1889_v49, -1e+30  ;;  %v739_v52 = vsel %vm737_vm5, %v1889_v49, -1e+30  ;;  %v761_v60 = vsel %vm1909_vm8, %v1889_v49, -1e+30 }
 0x2d4   : > { %752 = vmax.xlane.f32.xlu1 %v750_v51  ;;  %741 = vmax.xlane.f32.xlu0 %v739_v52  ;;  %v730_v53 = vpop.f32.mrf.mxu0 }
 0x2d5   : > { %v1897_v54 = vadd.f32 %v1131_v46, %v730_v53 }
 0x2d6   : > { %v1246_v55 = vpop.f32.mrf.mxu0 }
 0x2d7   : > { %v751_v56 = vsel %vm1884_vm4, %v1897_v54, -1e+30  ;;  %v740_v57 = vsel %vm737_vm5, %v1897_v54, -1e+30  ;;  %v762_v59 = vsel %vm1909_vm8, %v1897_v54, -1e+30 }
 0x2d8   : > { %754 = vmax.xlane.f32.xlu1 %v751_v56  ;;  %743 = vmax.xlane.f32.xlu0 %v740_v57 }
 0x2dc   : > { %765 = vmax.xlane.f32.xlu1 %v762_v59  ;;  %763 = vmax.xlane.f32.xlu0 %v761_v60 }
 0x35d   : > { %v753_v17 = vpop.xlane.xlu1 %752  ;;  %v742_v18 = vpop.xlane.xlu0 %741 }
 0x35e   : > { %v745_v21 = vsel %vm737_vm5, %v742_v18, 0.0 }
 0x35f   : > { %v756_v23 = vsel %vm1884_vm4, %v753_v17, %v745_v21 }
 0x361   : > { %v755_v19 = vpop.xlane.xlu1 %754  ;;  %v744_v20 = vpop.xlane.xlu0 %743 }
 0x362   : > { %v746_v22 = vsel %vm737_vm5, %v744_v20, 0.0 }
 0x363   : > { %v757_v24 = vsel %vm1884_vm4, %v755_v19, %v746_v22 }
 0x365   : > { %v766_v25 = vpop.xlane.xlu1 %765  ;;  %v764_v26 = vpop.xlane.xlu0 %763 }
 0x366   : > { %v768_v27 = vsel %vm1909_vm8, %v766_v25, %v757_v24  ;;  %v767_v28 = vsel %vm1909_vm8, %v764_v26, %v756_v23 }
 0x367   : > { %v770_v29 = vsub.f32 %v1897_v54, %v768_v27  ;;  %v769_v30 = vsub.f32 %v1889_v49, %v767_v28 }
 0x369   : > { %v773_v31 = vmul.f32 1.442695, %v770_v29  ;;  %v771_v32 = vmul.f32 1.442695, %v769_v30 }
 0x36b   : > { %1420 = vpow2.f32 %v773_v31 }
 0x36c   : > { %1422 = vpow2.f32 %v771_v32 }
 0x378   : > { %v1421_v33 = vpop.eup %1420 }
 0x379   : > { %v1423_v34 = vpop.eup %1422 }
 0x37a   : > { %1279 = vmatprep.mubr.f32.mxu1 %v1423_v34 }
 0x37b   : > { %1280 = vmatmul.mubr.f32.vlgmr.msra.gmra.mxu1 %v1421_v33 }
 0x43b   : > { %v1281_v46 = vpop.f32.mrf.mxu1 }
 0x43c   : > { %v868_v47 = vsel %vm866_vm9, %v1281_v46, 1.0 }
 0x43d   : > { %v857_v48 = vpop.f32.mrf.mxu1  ;;  %1424 = vlog2.f32 %v868_v47 }
 0x43e   : > { %v867_v49 = vsel %vm866_vm9, %v857_v48, 1.0 }
 0x43f   : > { %1426 = vlog2.f32 %v867_v49 }
 0x44a   : > { %v1425_v50 = vpop.eup %1424 }
 0x44b   : > { %v872_v53 = vmul.f32 0.6931472, %v1425_v50 }
 0x44c   : > { %v1427_v51 = vpop.eup %1426 }
 0x44d   : > { %v870_v52 = vmul.f32 0.6931472, %v1427_v51 }
 0x44f   : > { %1314 = vmatprep.mubr.f32.mxu0 %v870_v52 }
 0x450   : > { %1315 = vmatmul.mubr.f32.vlgmr.msra.gmra.mxu0 %v872_v53 }
 0x510   : > { %v1316_v54 = vpop.f32.mrf.mxu0 }
 0x511   : > { %v965_v55 = vsub.f32 %v770_v29, %v1316_v54 }
 0x512   : > { %v955_v56 = vpop.f32.mrf.mxu0 }
 0x513   : > { %v964_v57 = vsub.f32 %v769_v30, %v955_v56  ;;  %v967_v59 = vsel %vm759_vm7, %v965_v55, 0.0 }
 0x514   : > { %969 = vst [vmem:[%s430_s11 + $0x8] sm:$0xff] %v967_v59 }
 0x515   : > { %v966_v58 = vsel %vm759_vm7, %v964_v57, 0.0 }
 0x516   : > { %968 = vst [vmem:[%s430_s11] sm:$0xff] %v966_v58 }
 0x517 PF: > { %s23_s30 = sadd.s32 1, %s1632_s30  }
 0x518   : > { %p20_p3 = scmp.ge.s32.totalorder %s23_s30, 4  }
 0x51a   :  { %22 = sbr.rel (!%p20_p3) target bundleno = 4 (0x4), region = 115 }
 0x51f   :  { %992 = vsyncpa [#allocation3], 1 }
 0x520   :  { %994 = vsyncpa [#allocation3 + $0x1], 1 }
 0x521   :  { %995 = vsyncpa [#allocation5], 1 }
 0x522   :  { %996 = vsyncpa [#allocation8], 1 }
 0x523   :  { %997 = vsyncpa [#allocation11], 1 }

</bundles_post_ra>
